<compile_context>
chip_gen: v6e
topology: v6e:2x2x1
jax: 0.10.0
libtpu: 0.0.40
codegen_flags: <defaults>
</compile_context>

<pallas_src>
import functools

import jax
import jax.numpy as jnp
from jax.experimental import pallas as pl
from jax.experimental.pallas import tpu as pltpu


def focal_loss_kernel(logits_ref, targets_ref, out_ref, acc_ref, *,
                      n_total, tile_n, tiles_per_part, alpha, gamma):
    p = pl.program_id(0)          # partial-sum axis (2-TC split on v7x opt-in)
    i = pl.program_id(1)          # sequential reduction axis within a partial

    @pl.when(i == 0)
    def _():
        acc_ref[0] = jnp.float32(0.0)

    logits = logits_ref[...].astype(jnp.float32)      # (TN, C) f32 compute
    tgt = targets_ref[...]                            # (TN, 1) int32
    tn, c = logits.shape

    # Numerically-stable log-softmax over the class (lane) axis.
    m = jnp.max(logits, axis=-1, keepdims=True)       # (TN, 1)
    shifted = logits - m                              # (TN, C)
    lse = jnp.log(jnp.sum(jnp.exp(shifted), axis=-1, keepdims=True))  # (TN, 1)

    # Gather the target logit: compare + select (no one-hot cast/multiply).
    col = jax.lax.broadcasted_iota(jnp.int32, (tn, c), 1)
    tgt_shifted = jnp.sum(jnp.where(col == tgt, shifted, 0.0),
                          axis=-1, keepdims=True)     # (TN, 1)

    # ce >= 0 mathematically; clamp away rounding so pow() never sees a
    # negative base (pow(neg, 0.7) -> NaN).
    ce = jnp.maximum(lse - tgt_shifted, 0.0)          # (TN, 1)
    pt = jnp.exp(-ce)
    base = jnp.maximum(1.0 - pt, 0.0)
    focal = alpha * jnp.power(base, gamma) * ce       # (TN, 1)

    # Mask padded / overhang rows (global LOGICAL row index >= n_total).
    # Must stay a where-select: garbage rows may hold NaN/inf from the ragged
    # edge-block DMA and a multiply-mask would propagate them.
    row_start = (p * tiles_per_part + i) * tile_n
    rows = row_start + jax.lax.broadcasted_iota(jnp.int32, (tn, 1), 0)
    focal = jnp.where(rows < n_total, focal, 0.0)

    # Per-step scalar reduce into SMEM scratch (XLU/scalar slots have slack;
    # avoids a lane-padded VMEM accumulator and its per-step stores).
    acc_ref[0] += jnp.sum(focal)

    # Only the last inner step touches the SMEM partial-sum output block.
    @pl.when(i == tiles_per_part - 1)
    def _():
        out_ref[0, 0] = acc_ref[0]


def _round_up(x, m):
    return ((x + m - 1) // m) * m


def _vmem_capacity_bytes():
    """Best-effort physical-VMEM query; conservative fallback if unavailable."""
    try:
        info = pltpu.get_tpu_info()
        cap = getattr(info, "vmem_capacity_bytes", None)
        if cap:
            return int(cap)
    except Exception:
        pass
    return 64 * 1024 * 1024   # assume the smallest (v7x per-core) if unknown


def focal_loss(logits, targets, *, alpha=0.8, gamma=0.7, reduction="mean",
               num_partials=1, tile_n=None, vmem_limit_bytes=None,
               core_parallel=False):
    """logits: (N, C) float32/bfloat16; targets: (N,) int. Returns scalar f32."""
    n, c = logits.shape
    elem_bytes = jnp.dtype(logits.dtype).itemsize
    targets = targets.reshape(-1).astype(jnp.int32)       # == targets.view(-1)

    # Generation-aware VMEM budget: v5e/v6e have 128 MiB physical VMEM,
    # v7x has 64 MiB per TensorCore -- don't carry one config to the other.
    vmem_cap = _vmem_capacity_bytes()
    if vmem_cap >= 96 * 1024 * 1024:          # v5e / v6e
        default_limit = 80 * 1024 * 1024
        tile_budget = 44 * 1024 * 1024
    else:                                     # v7x (or unknown -> conservative)
        default_limit = 48 * 1024 * 1024
        tile_budget = 26 * 1024 * 1024
    if vmem_limit_bytes is None:
        vmem_limit_bytes = default_limit

    if tile_n is None:
        # Pure byte-based row budget, from the REAL input dtype:
        #   2x double-buffered logits tiles (input dtype)
        # + 2x double-buffered (row,1) int32 targets tiles (lane-padded to 128)
        # + ~3 rows of f32 in-kernel temporaries (upcast/shifted/exp/mask).
        per_row_bytes = 2 * c * elem_bytes + 2 * 128 * 4 + 3 * c * 4
        tile_n = tile_budget // per_row_bytes
        # Bound the lane-padded targets buffer / strided targets DMA length.
        tile_n = min(tile_n, 8192)
    # Never allocate a bigger tile than one partial actually needs; multiple of 8.
    rows_needed = _round_up(-(-n // num_partials), 8)
    tile_n = int(max(8, min((int(tile_n) // 8) * 8, rows_needed)))

    total_tiles = -(-n // tile_n)                          # ceil
    tiles_per_part = -(-total_tiles // num_partials)       # ceil
    max_tile = total_tiles - 1

    targets_2d = targets.reshape(n, 1)                     # no logits padding!

    kernel = functools.partial(
        focal_loss_kernel,
        n_total=n, tile_n=tile_n, tiles_per_part=tiles_per_part,
        alpha=float(alpha), gamma=float(gamma),
    )

    def row_block(p, i):
        # Clamp so a trailing partial never requests a fully out-of-range
        # block; its (logical) rows are masked to zero inside the kernel.
        return (jnp.minimum(p * tiles_per_part + i, max_tile), 0)

    # TODO(synk): on v7x, profile that both TensorCores are busy; if not, call
    # with core_parallel=True to force the 2-TC split of the leading axis.
    lead_sem = pltpu.CORE_PARALLEL if core_parallel else "parallel"

    partials = pl.pallas_call(
        kernel,
        out_shape=jax.ShapeDtypeStruct((num_partials, 1), jnp.float32),
        grid=(num_partials, tiles_per_part),
        in_specs=[
            pl.BlockSpec((tile_n, c), row_block),
            pl.BlockSpec((tile_n, 1), row_block),
        ],
        # Distinct output block per partial -> no cross-core accumulation race.
        out_specs=pl.BlockSpec((1, 1), lambda p, i: (p, 0),
                               memory_space=pltpu.SMEM),
        scratch_shapes=[pltpu.SMEM((1,), jnp.float32)],
        compiler_params=pltpu.CompilerParams(
            dimension_semantics=(lead_sem, "arbitrary"),
            vmem_limit_bytes=int(vmem_limit_bytes),
        ),
    )(logits, targets_2d)

    total = jnp.sum(partials)
    if reduction == "sum":
        return total
    if reduction == "mean":
        return total / jnp.float32(n)
    # TODO(synk): reduction='none' (per-sample vector output) not implemented.
    raise NotImplementedError("reduction must be 'mean' or 'sum'")


def focal_loss_ref(logits, targets, *, alpha=0.8, gamma=0.7):
    """Pure-JAX reference matching torch.nn.functional.cross_entropy semantics."""
    logits = logits.astype(jnp.float32)
    logz = jax.nn.logsumexp(logits, axis=-1)
    tgt_logit = jnp.take_along_axis(logits, targets[:, None], axis=-1)[:, 0]
    ce = logz - tgt_logit
    pt = jnp.exp(-ce)
    focal = alpha * (1.0 - pt) ** gamma * ce
    return jnp.mean(focal)


if __name__ == "__main__":
    key = jax.random.PRNGKey(0)
    keys = jax.random.split(key, 8)

    # 1) Small, aligned case.
    N, C = 16, 32
    logits = jax.random.normal(keys[0], (N, C), dtype=jnp.float32)
    targets = jax.random.randint(keys[1], (N,), 0, C, dtype=jnp.int32)
    out = jax.block_until_ready(focal_loss(logits, targets))
    ref = focal_loss_ref(logits, targets)
    assert jnp.allclose(out, ref, rtol=1e-5, atol=1e-5), (out, ref)

    # 2) Ragged N (not a multiple of 8) -> exercises the un-padded edge block
    #    plus in-kernel row masking.
    N2, C2 = 50, 32
    logits2 = jax.random.normal(keys[2], (N2, C2), dtype=jnp.float32)
    targets2 = jax.random.randint(keys[3], (N2,), 0, C2, dtype=jnp.int32)
    out2 = jax.block_until_ready(focal_loss(logits2, targets2))
    ref2 = focal_loss_ref(logits2, targets2)
    assert jnp.allclose(out2, ref2, rtol=1e-5, atol=1e-5), (out2, ref2)

    # 3) Multi-tile, two partial sums, ragged last tile, clamped overhang tile.
    N3, C3 = 300, 40
    logits3 = jax.random.normal(keys[4], (N3, C3), dtype=jnp.float32)
    targets3 = jax.random.randint(keys[5], (N3,), 0, C3, dtype=jnp.int32)
    out3 = jax.block_until_ready(
        focal_loss(logits3, targets3, tile_n=64, num_partials=2))
    ref3 = focal_loss_ref(logits3, targets3)
    assert jnp.allclose(out3, ref3, rtol=1e-5, atol=1e-5), (out3, ref3)

    # 4) bfloat16 logits (halved HBM bytes; upcast to f32 inside the kernel).
    N4, C4 = 100, 64
    logits4 = jax.random.normal(keys[6], (N4, C4),
                                dtype=jnp.float32).astype(jnp.bfloat16)
    targets4 = jax.random.randint(keys[7], (N4,), 0, C4, dtype=jnp.int32)
    out4 = jax.block_until_ready(focal_loss(logits4, targets4))
    ref4 = focal_loss_ref(logits4, targets4)
    assert jnp.allclose(out4, ref4, rtol=1e-5, atol=1e-5), (out4, ref4)

    print("KERNEL_OK")
</pallas_src>

<mosaic_0001>
module attributes {stable_mosaic.version = 11 : i64} {
  func.func @focal_loss_kernel(%arg0: i32, %arg1: i32, %arg2: memref<16x32xf32, #tpu.memory_space<vmem>>, %arg3: memref<16x1xi32, #tpu.memory_space<vmem>>, %arg4: memref<1x1xf32, #tpu.memory_space<smem>>, %arg5: memref<1xf32, #tpu.memory_space<smem>>) attributes {dimension_semantics = [#tpu.dimension_semantics<parallel>, #tpu.dimension_semantics<arbitrary>], iteration_bounds = array<i64: 1, 1>, scalar_prefetch = 0 : i64, scratch_operands = 1 : i64, tpu.core_type = #tpu.core_type<tc>, window_params = [{transform_indices = @transform_0, window_bounds = array<i64: 16, 32>}, {transform_indices = @transform_1, window_bounds = array<i64: 16, 1>}, {transform_indices = @transform_2, window_bounds = array<i64: 1, 1>}]} {
    %c0_i32 = arith.constant 0 : i32
    %0 = arith.cmpi eq, %arg1, %c0_i32 : i32
    %1 = arith.extui %0 : i1 to i32
    %c0_i32_0 = arith.constant 0 : i32
    %2 = arith.cmpi ne, %1, %c0_i32_0 : i32
    scf.if %2 {
      %cst_20 = arith.constant 0.000000e+00 : f32
      %c0_21 = arith.constant 0 : index
      %55 = memref.load %arg5[%c0_21] : memref<1xf32, #tpu.memory_space<smem>>
      memref.store %cst_20, %arg5[%c0_21] : memref<1xf32, #tpu.memory_space<smem>>
    } else {
    }
    %c0 = arith.constant 0 : index
    %c0_1 = arith.constant 0 : index
    %3 = vector.load %arg2[%c0, %c0_1] : memref<16x32xf32, #tpu.memory_space<vmem>>, vector<16x32xf32>
    %c0_2 = arith.constant 0 : index
    %c0_3 = arith.constant 0 : index
    %4 = vector.load %arg3[%c0_2, %c0_3] : memref<16x1xi32, #tpu.memory_space<vmem>>, vector<16x1xi32>
    %cst = arith.constant dense<0xFF800000> : vector<16xf32>
    %5 = vector.multi_reduction <maximumf>, %3, %cst [1] : vector<16x32xf32> to vector<16xf32>
    %6 = vector.shape_cast %5 : vector<16xf32> to vector<16x1xf32>
    %7 = vector.broadcast %6 : vector<16x1xf32> to vector<16x32xf32>
    %8 = arith.subf %3, %7 : vector<16x32xf32>
    %9 = math.exp %8 : vector<16x32xf32>
    %cst_4 = arith.constant dense<0.000000e+00> : vector<16xf32>
    %10 = vector.multi_reduction <add>, %9, %cst_4 [1] : vector<16x32xf32> to vector<16xf32>
    %11 = vector.shape_cast %10 : vector<16xf32> to vector<16x1xf32>
    %12 = math.log %11 : vector<16x1xf32>
    %13 = tpu.iota {dimensions = array<i32: 1>} : vector<16x32xi32>
    %14 = vector.broadcast %4 : vector<16x1xi32> to vector<16x32xi32>
    %15 = arith.cmpi eq, %13, %14 : vector<16x32xi32>
    %cst_5 = arith.constant 0.000000e+00 : f32
    %16 = vector.broadcast %cst_5 : f32 to vector<16x32xf32>
    %17 = arith.select %15, %8, %16 : vector<16x32xi1>, vector<16x32xf32>
    %cst_6 = arith.constant dense<0.000000e+00> : vector<16xf32>
    %18 = vector.multi_reduction <add>, %17, %cst_6 [1] : vector<16x32xf32> to vector<16xf32>
    %19 = vector.shape_cast %18 : vector<16xf32> to vector<16x1xf32>
    %20 = arith.subf %12, %19 : vector<16x1xf32>
    %cst_7 = arith.constant 0.000000e+00 : f32
    %21 = vector.broadcast %cst_7 : f32 to vector<16x1xf32>
    %22 = arith.maximumf %20, %21 : vector<16x1xf32>
    %cst_8 = arith.constant 0.000000e+00 : f32
    %23 = vector.broadcast %cst_8 : f32 to vector<16x1xf32>
    %24 = arith.subf %23, %22 : vector<16x1xf32>
    %25 = math.exp %24 : vector<16x1xf32>
    %cst_9 = arith.constant 1.000000e+00 : f32
    %26 = vector.broadcast %cst_9 : f32 to vector<16x1xf32>
    %27 = arith.subf %26, %25 : vector<16x1xf32>
    %cst_10 = arith.constant 0.000000e+00 : f32
    %28 = vector.broadcast %cst_10 : f32 to vector<16x1xf32>
    %29 = arith.maximumf %27, %28 : vector<16x1xf32>
    %cst_11 = arith.constant 0.699999988 : f32
    %30 = vector.broadcast %cst_11 : f32 to vector<16x1xf32>
    %31 = math.powf %29, %30 : vector<16x1xf32>
    %cst_12 = arith.constant 8.000000e-01 : f32
    %32 = vector.broadcast %cst_12 : f32 to vector<16x1xf32>
    %33 = arith.mulf %32, %31 : vector<16x1xf32>
    %34 = arith.mulf %33, %22 : vector<16x1xf32>
    %c1_i32 = arith.constant 1 : i32
    %35 = arith.muli %arg0, %c1_i32 : i32
    %36 = arith.addi %35, %arg1 : i32
    %c16_i32 = arith.constant 16 : i32
    %37 = arith.muli %36, %c16_i32 : i32
    %38 = tpu.iota {dimensions = array<i32: 0>} : vector<16x1xi32>
    %39 = vector.broadcast %37 : i32 to vector<16x1xi32>
    %40 = arith.addi %39, %38 : vector<16x1xi32>
    %c16_i32_13 = arith.constant 16 : i32
    %41 = vector.broadcast %c16_i32_13 : i32 to vector<16x1xi32>
    %42 = arith.cmpi slt, %40, %41 : vector<16x1xi32>
    %cst_14 = arith.constant 0.000000e+00 : f32
    %43 = vector.broadcast %cst_14 : f32 to vector<16x1xf32>
    %44 = arith.select %42, %34, %43 : vector<16x1xi1>, vector<16x1xf32>
    %c0_15 = arith.constant 0 : index
    %45 = memref.load %arg5[%c0_15] : memref<1xf32, #tpu.memory_space<smem>>
    %46 = vector.shape_cast %44 : vector<16x1xf32> to vector<1x16x1xf32>
    %cst_16 = arith.constant dense<0.000000e+00> : vector<1xf32>
    %47 = vector.multi_reduction <add>, %46, %cst_16 [1, 2] : vector<1x16x1xf32> to vector<1xf32>
    %48 = vector.shape_cast %47 : vector<1xf32> to vector<1x1x1xf32>
    %49 = vector.extract %48[0, 0, 0] : f32 from vector<1x1x1xf32>
    %50 = arith.addf %45, %49 : f32
    %c0_17 = arith.constant 0 : index
    %51 = memref.load %arg5[%c0_17] : memref<1xf32, #tpu.memory_space<smem>>
    memref.store %50, %arg5[%c0_17] : memref<1xf32, #tpu.memory_space<smem>>
    %c0_i32_18 = arith.constant 0 : i32
    %52 = arith.cmpi eq, %arg1, %c0_i32_18 : i32
    %53 = arith.extui %52 : i1 to i32
    %c0_i32_19 = arith.constant 0 : i32
    %54 = arith.cmpi ne, %53, %c0_i32_19 : i32
    scf.if %54 {
      %c0_20 = arith.constant 0 : index
      %55 = memref.load %arg5[%c0_20] : memref<1xf32, #tpu.memory_space<smem>>
      %c0_21 = arith.constant 0 : index
      %c0_22 = arith.constant 0 : index
      %56 = memref.load %arg4[%c0_21, %c0_22] : memref<1x1xf32, #tpu.memory_space<smem>>
      memref.store %55, %arg4[%c0_21, %c0_22] : memref<1x1xf32, #tpu.memory_space<smem>>
    } else {
    }
    return
  }
  func.func @transform_0(%arg0: i32, %arg1: i32) -> (i32, i32) {
    %c1_i32 = arith.constant 1 : i32
    %0 = arith.muli %arg0, %c1_i32 : i32
    %1 = arith.addi %0, %arg1 : i32
    %c0_i32 = arith.constant 0 : i32
    %2 = arith.minsi %1, %c0_i32 : i32
    %c0_i32_0 = arith.constant 0 : i32
    %c0_i32_1 = arith.constant 0 : i32
    return %2, %c0_i32_0 : i32, i32
  }
  func.func @transform_1(%arg0: i32, %arg1: i32) -> (i32, i32) {
    %c1_i32 = arith.constant 1 : i32
    %0 = arith.muli %arg0, %c1_i32 : i32
    %1 = arith.addi %0, %arg1 : i32
    %c0_i32 = arith.constant 0 : i32
    %2 = arith.minsi %1, %c0_i32 : i32
    %c0_i32_0 = arith.constant 0 : i32
    %c0_i32_1 = arith.constant 0 : i32
    return %2, %c0_i32_0 : i32, i32
  }
  func.func @transform_2(%arg0: i32, %arg1: i32) -> (i32, i32) {
    %c0_i32 = arith.constant 0 : i32
    %c0_i32_0 = arith.constant 0 : i32
    return %arg0, %c0_i32 : i32, i32
  }
}

</mosaic_0001>

<bundles_post_ra>
// kernel: tpu_custom_call.1
= control target key start
LH: loop header
LB: loop body
LE: loop exit
PB: predicated region body
PF: predicated region fallthrough
CT: control target
= control target key end

     0   :  { %vm86_vm0 = vcmask 261120   ;;  %v295_v4 = vmov 0   ;;  %s333_s0 = inlined_call_operand.vmem [shape: f32[16,32], index: 0, kind: input, shape index: {}]   ;;  %s334_s1 = inlined_call_operand.vmem [shape: s32[16,1], index: 1, kind: input, shape index: {}]   ;;  %s335_s2 = inlined_call_operand.hbm [shape: f32[1,1], index: 2, kind: output, shape index: {}]  }
   0x1   :  { %v82_v0 = vld [vmem:[%s333_s0] sm:$0xff]  ;;  %v83_v1 = vld [vmem:[%s333_s0 + $0x8] sm:$0xff]  ;;  %263 = vset.pattern.permute.xlu1 %v295_v4  ;;  %264 = vset.pattern.permute.xlu0 %v295_v4 }
   0x2   :  { %v84_v2 = vld [vmem:[%s334_s1] sm:$0xff]  ;;  %v87_v3 = vsel %vm86_vm0, %v82_v0, -inf }
   0x3   :  { %7 = vsyncpa [#allocation4], 0  ;;  %88 = vmax.xlane.f32.xlu0 %v87_v3  ;;  %112 = vperm.xlu1 %263, %v84_v2   ;;  %v90_v5 = vsel %vm86_vm0, %v83_v1, -inf  ;;  %v85_v6 = vld [vmem:[%s334_s1 + $0x8] sm:$0xff]  ;;  %v109_v13 = vlaneseq  ;;  %vm160_vm13 = vcmask 7168   ;;  %s296_s1 = smov [#allocation3]  }
   0x5   :  { %v110_v15 = vand.u32 127, %v109_v13 }
   0x7   :  { %91 = vmax.xlane.f32.xlu0 %v90_v5  ;;  %115 = vperm.xlu1 %263, %v85_v6  }
  0x7e   :  { %v113_v14 = vpop.permute.xlu1 %112 }
  0x7f   :  { %vm117_vm1 = vcmp.eq.s32.totalorder %v110_v15, %v113_v14 }
  0x82   :  { %v116_v17 = vpop.permute.xlu1 %115 }
  0x83   :  { %vm118_vm2 = vcmp.eq.s32.totalorder %v110_v15, %v116_v17 }
  0x8c   :  { %v89_v7 = vpop.xlane.xlu0 %88 }
  0x8d   :  { %v93_v8 = vsub.f32 %v82_v0, %v89_v7 }
  0x8f   :  { %v95_v9 = vmul.f32 1.442695, %v93_v8  ;;  %v119_v19 = vsel %vm117_vm1, %v93_v8, 0.0 }
  0x90   :  { %v92_v10 = vpop.xlane.xlu0 %91  ;;  %v121_v21 = vsel %vm86_vm0, %v119_v19, 0.0 }
  0x91   :  { %265 = vpow2.f32 %v95_v9  ;;  %v94_v11 = vsub.f32 %v83_v1, %v92_v10 }
  0x93   :  { %v97_v12 = vmul.f32 1.442695, %v94_v11  ;;  %v120_v23 = vsel %vm118_vm2, %v94_v11, 0.0 }
  0x94   :  { %v124_v24 = vsel %vm86_vm0, %v120_v23, 0.0 }
  0x95   :  { %267 = vpow2.f32 %v97_v12 }
  0x9e   :  { %v266_v16 = vpop.eup %265 }
  0x9f   :  { %v99_v18 = vsel %vm86_vm0, %v266_v16, 0.0 }
  0xa0   :  { %100 = vadd.xlane.f32.xlu0 %v99_v18 }
  0xa2   :  { %v268_v20 = vpop.eup %267 }
  0xa3   :  { %v102_v22 = vsel %vm86_vm0, %v268_v20, 0.0 }
  0xa4   :  { %122 = vadd.xlane.f32.xlu0 %v121_v21  ;;  %103 = vadd.xlane.f32.xlu1 %v102_v22 }
  0xa8   :  { %125 = vadd.xlane.f32.xlu0 %v124_v24 }
 0x129   :  { %v101_v25 = vpop.xlane.xlu0 %100 }
 0x12a   :  { %269 = vlog2.f32 %v101_v25 }
 0x12d   :  { %v104_v26 = vpop.xlane.xlu1 %103  ;;  %v123_v28 = vpop.xlane.xlu0 %122 }
 0x12e   :  { %271 = vlog2.f32 %v104_v26 }
 0x131   :  { %v126_v34 = vpop.xlane.xlu0 %125 }
 0x137   :  { %v270_v27 = vpop.eup %269 }
 0x138   :  { %v106_v29 = vmul.f32 0.6931472, %v270_v27 }
 0x13a   :  { %v127_v30 = vsub.f32 %v106_v29, %v123_v28 }
 0x13b   :  { %v272_v31 = vpop.eup %271 }
 0x13c   :  { %v129_v32 = vmax.f32 %v127_v30, 0.0  ;;  %v108_v33 = vmul.f32 0.6931472, %v272_v31 }
 0x13e   :  { %v131_v35 = vsub.f32 0.0, %v129_v32  ;;  %v128_v36 = vsub.f32 %v108_v33, %v126_v34 }
 0x140   :  { %v133_v37 = vmul.f32 1.442695, %v131_v35  ;;  %v130_v38 = vmax.f32 %v128_v36, 0.0 }
 0x142   :  { %273 = vpow2.f32 %v133_v37  ;;  %v132_v39 = vsub.f32 0.0, %v130_v38 }
 0x144   :  { %v135_v40 = vmul.f32 1.442695, %v132_v39 }
 0x146   :  { %275 = vpow2.f32 %v135_v40 }
 0x14f   :  { %v274_v41 = vpop.eup %273 }
 0x150   :  { %v137_v42 = vsub.f32 1.0, %v274_v41 }
 0x152   :  { %v139_v43 = vmax.f32 %v137_v42, 0.0 }
 0x153   :  { %v276_v44 = vpop.eup %275 }
 0x154   :  { %v211_v45 = vand.u32 2147483647, %v139_v43  ;;  %v138_v46 = vsub.f32 1.0, %v276_v44  ;;  %vm215_vm3 = vcmp.lt.f32.partialorder %v139_v43, 0  ;;  %vm216_vm4 = vcmp.eq.f32.partialorder %v139_v43, 0 }
 0x155   :  { %vm228_vm6 = vcmp.ne.f32.partialorder %v139_v43, %v139_v43  ;;  %vm217_vm7 = vcmp.eq.f32.partialorder %v139_v43, 1065353216 }
 0x156   :  { %277 = vlog2.f32 %v211_v45  ;;  %v140_v47 = vmax.f32 %v138_v46, 0.0  ;;  %vm220_vm5 = vcmp.eq.f32.partialorder %v211_v45, 2139095040 }
 0x158   :  { %v237_v48 = vand.u32 2147483647, %v140_v47  ;;  %vm241_vm8 = vcmp.lt.f32.partialorder %v140_v47, 0  ;;  %vm242_vm9 = vcmp.eq.f32.partialorder %v140_v47, 0  ;;  %vm254_vm11 = vcmp.ne.f32.partialorder %v140_v47, %v140_v47 }
 0x159   :  { %vm243_vm12 = vcmp.eq.f32.partialorder %v140_v47, 1065353216 }
 0x15a   :  { %279 = vlog2.f32 %v237_v48  ;;  %vm246_vm10 = vcmp.eq.f32.partialorder %v237_v48, 2139095040 }
 0x163   :  { %v278_v49 = vpop.eup %277 }
 0x164   :  { %v213_v50 = vmul.f32 0.7, %v278_v49 }
 0x166   :  { %281 = vpow2.f32 %v213_v50 }
 0x167   :  { %v280_v51 = vpop.eup %279 }
 0x168   :  { %v239_v52 = vmul.f32 0.7, %v280_v51 }
 0x16a   :  { %283 = vpow2.f32 %v239_v52 }
 0x173   :  { %v282_v53 = vpop.eup %281 }
 0x174   :  { %v221_v54 = vsel %vm215_vm3, 2143289344, %v282_v53 }
 0x175   :  { %v222_v55 = vsel %vm216_vm4, 0, %v221_v54 }
 0x176   :  { %v227_v56 = vsel %vm220_vm5, 2139095040, %v222_v55 }
 0x177   :  { %v231_v57 = vsel %vm228_vm6, 2143289344, %v227_v56  ;;  %v284_v58 = vpop.eup %283 }
 0x178   :  { %v232_v59 = vsel %vm217_vm7, 1065353216, %v231_v57  ;;  %v247_v60 = vsel %vm241_vm8, 2143289344, %v284_v58 }
 0x179   :  { %v143_v61 = vmul.f32 0.8, %v232_v59  ;;  %v248_v62 = vsel %vm242_vm9, 0, %v247_v60 }
 0x17a   :  { %v253_v63 = vsel %vm246_vm10, 2139095040, %v248_v62 }
 0x17b   :  { %v257_v0 = vsel %vm254_vm11, 2143289344, %v253_v63  ;;  %v145_v2 = vmul.f32 %v143_v61, %v129_v32 }
 0x17c   :  { %v258_v1 = vsel %vm243_vm12, 1065353216, %v257_v0 }
 0x17d   :  { %v144_v3 = vmul.f32 0.8, %v258_v1  ;;  %v161_v5 = vsel %vm160_vm13, %v145_v2, 0.0 }
 0x17f   :  { %v146_v4 = vmul.f32 %v144_v3, %v130_v38 }
 0x181   :  { %v162_v6 = vsel %vm160_vm13, %v146_v4, 0.0 }
 0x182   :  { %v163_v7 = vadd.f32 %v162_v6, %v161_v5 }
 0x184   :  { %164 = vadd.xlane.f32.xlu0 %v163_v7 }
 0x20d   :  { %v165_v8 = vpop.xlane.xlu0 %164 }
 0x20e   :  { %v166_v9 = vrot.slane %v165_v8, 4 }
 0x210   :  { %v167_v10 = vadd.f32 %v166_v9, %v165_v8 }
 0x212   :  { %v168_v11 = vrot.slane %v167_v10, 2 }
 0x214   :  { %v169_v12 = vadd.f32 %v168_v11, %v167_v10 }
 0x216   :  { %v170_v13 = vrot.slane %v169_v12, 1 }
 0x218   :  { %v171_v14 = vadd.f32 %v170_v13, %v169_v12 }
 0x21a   :  { %259 = vpush %v171_v14 }
 0x24b   :  { %s260_s0 = spop %259 }
 0x24c   :  { %181 = sst [smem:[#allocation3]] %s260_s0 }
 0x24d   :  { %189 = dma.smem_to_hbm %s296_s1, 16, %s335_s2, [#allocation4]  }
 0x24e   :  { %293 = dma.done.wait [#allocation4], 16  }
 0x24f   :  { %294 = vsyncadd [#allocation4], 4294967280 }
 0x250   :  { %193 = sfence }
 0x251   :  { %194 = vsyncpa [#allocation4], 1 }

</bundles_post_ra>
